<compile_context>
chip_gen: v7x
topology: tpu7x:2x2x1
jax: 0.10.0
libtpu: 0.0.40
codegen_flags: <defaults>
</compile_context>

<pallas_src>
import math

import jax
import jax.numpy as jnp
from jax.experimental import pallas as pl
from jax.experimental.pallas import tpu as pltpu


def _round_up(x, n):
    return ((x + n - 1) // n) * n


def _sublane(dtype):
    """Minimum sublane multiple for a dtype (8 for 4B, 16 for 2B, 32 for 1B)."""
    return max(8, 32 // jnp.dtype(dtype).itemsize)


def _vmem_capacity_bytes():
    """Per-core VMEM capacity; conservative fallback (v7x = 64 MiB per TC)."""
    try:
        cap = getattr(pltpu.get_tpu_info(), "vmem_capacity_bytes", None)
        if cap:
            return int(cap)
    except Exception:
        pass
    return 64 * 1024 * 1024


def _make_mlp_kernel(num_layers, activation, compute_dtype):
    """Fused MLP body: all linears + activations, params stay VMEM-resident."""

    def kernel(*refs):
        x_ref = refs[0]
        w_refs = refs[1:1 + num_layers]
        b_refs = refs[1 + num_layers:1 + 2 * num_layers]
        o_ref = refs[-1]

        # In-kernel cast == `inputs.to(config.dtype)` (keeps the HBM stream at
        # x's native width; no separate wrapper cast pass over x).
        x = x_ref[...].astype(compute_dtype)
        for i in range(num_layers):
            y = jnp.dot(x, w_refs[i][...],
                        preferred_element_type=jnp.float32)      # MXU, f32 acc
            y = y + b_refs[i][...].astype(jnp.float32)           # (1, d) bcast
            if i < num_layers - 1:
                x = activation(y).astype(compute_dtype)          # f32 act (EUP)
            else:
                o_ref[...] = y.astype(o_ref.dtype)

    return kernel


def class_head_forward(x, weights, biases=None, activation=jnp.tanh, tm=None):
    """Pallas forward for ClassHead.

    x:       (..., model_dim), any leading shape / dtype.
    weights: list of (d_in, d_out) arrays (transposed vs. PyTorch's (out, in)).
    biases:  list of (d_out,) or (1, d_out) arrays, or None for bias=False.
    """
    num_layers = len(weights)
    assert num_layers >= 1
    dt = weights[0].dtype                                # config.dtype
    dims = [int(weights[0].shape[0])] + [int(w.shape[1]) for w in weights]
    if biases is None:                                   # bias=False config
        biases = [jnp.zeros((d,), dt) for d in dims[1:]]
    assert len(biases) == num_layers

    lead_shape = x.shape[:-1]
    assert x.shape[-1] == dims[0]
    m = math.prod(lead_shape) if lead_shape else 1
    x2 = x.reshape(m, dims[0])                           # metadata only

    weights = [w.astype(dt) for w in weights]            # no-ops if already dt
    biases = [b.reshape(1, -1).astype(dt) for b in biases]

    x_isz = jnp.dtype(x2.dtype).itemsize
    p_isz = jnp.dtype(dt).itemsize
    d_in, d_out = dims[0], dims[-1]
    param_bytes = (sum(w.size for w in weights)
                   + sum(b.size for b in biases)) * p_isz

    # --- row-tile selection: budget-driven, sublane-aligned -------------------
    sublane = max(_sublane(x2.dtype), _sublane(dt))
    cap = _vmem_capacity_bytes()
    budget = min(cap // 2, 40 * 1024 * 1024)
    if tm is None:
        per_row = (2 * d_in * x_isz + 2 * d_out * p_isz          # dbl-buf I/O
                   + 4 * (d_in + 2 * max(dims)))                 # f32 temps
        avail = max(budget - 2 * param_bytes, 1 << 20)
        tm = min(4096, max(sublane, avail // per_row), _round_up(m, sublane))
        tm = max(sublane, (tm // sublane) * sublane)
        # v7x megacore: keep >= 2 grid steps when one step would cover a big M.
        if tm >= 1024 and pl.cdiv(m, tm) < 2:
            tm = max(sublane, _round_up(pl.cdiv(m, 2), sublane))
    else:
        tm = max(sublane, _round_up(tm, sublane))

    grid = (pl.cdiv(m, tm),)            # ragged tail -> masked boundary block

    kernel = _make_mlp_kernel(num_layers, activation, dt)

    # --- cost estimate: real (unpadded) traffic --------------------------------
    flops = 2 * m * sum(di * do for di, do in zip(dims[:-1], dims[1:]))
    transcendentals = m * sum(dims[1:-1])
    bytes_accessed = m * (d_in * x_isz + d_out * p_isz) + param_bytes
    cost = pl.CostEstimate(flops=flops, transcendentals=transcendentals,
                           bytes_accessed=bytes_accessed)

    # --- VMEM limit: always explicit, generation-safe cap ----------------------
    est_vmem = (2 * tm * d_in * x_isz + 2 * tm * d_out * p_isz
                + 2 * param_bytes + 4 * tm * (d_in + 2 * max(dims)))
    hard_cap = min(cap * 7 // 8, 56 * 1024 * 1024)
    vmem_limit = int(min(hard_cap, max(est_vmem * 5 // 4, 16 * 1024 * 1024)))

    def call(single_buffer_params):
        in_specs = [pl.BlockSpec((tm, d_in), lambda i: (i, 0))]
        for arr in (*weights, *biases):
            if single_buffer_params:
                spec = pl.BlockSpec(arr.shape, lambda i: (0, 0),
                                    pipeline_mode=pl.Buffered(1))
            else:
                spec = pl.BlockSpec(arr.shape, lambda i: (0, 0))
            in_specs.append(spec)
        return pl.pallas_call(
            kernel,
            out_shape=jax.ShapeDtypeStruct((m, d_out), dt),
            grid=grid,
            in_specs=in_specs,
            out_specs=pl.BlockSpec((tm, d_out), lambda i: (i, 0)),
            compiler_params=pltpu.CompilerParams(
                dimension_semantics=("parallel",),
                vmem_limit_bytes=vmem_limit),
            cost_estimate=cost,
        )(x2, *weights, *biases)

    try:
        out2d = call(True)      # grid-invariant params: single VMEM buffer
    except Exception:
        out2d = call(False)     # fallback: default double-buffering
    return out2d.reshape(*lead_shape, d_out)


def init_class_head_params(key, model_dim, hidden_dim, num_classes,
                           dtype=jnp.float32):
    """Synthetic init mirroring nn.Linear shapes (weights stored as (in, out))."""
    dims = [model_dim] + list(hidden_dim) + [num_classes]
    weights, biases = [], []
    for d_in, d_out in zip(dims[:-1], dims[1:]):
        key, wk, bk = jax.random.split(key, 3)
        bound = 1.0 / (d_in ** 0.5)          # PyTorch Linear default uniform bound
        weights.append(jax.random.uniform(wk, (d_in, d_out), dtype, -bound, bound))
        biases.append(jax.random.uniform(bk, (1, d_out), dtype, -bound, bound))
    return weights, biases


def _ref_forward(x, weights, biases, activation=jnp.tanh):
    """Pure-JAX reference of the same math (f32)."""
    lead = x.shape[:-1]
    h = x.reshape(-1, x.shape[-1]).astype(jnp.float32)
    for i, (w, b) in enumerate(zip(weights, biases)):
        h = h @ w.astype(jnp.float32) + b.reshape(1, -1).astype(jnp.float32)
        if i < len(weights) - 1:
            h = activation(h)
    return h.reshape(*lead, weights[-1].shape[1])


if __name__ == "__main__":
    # ClassHeadConfig(num_classes=16, model_dim=32, hidden_dim=[64],
    #                 bias=True, activation=tanh)
    batch, seq, model_dim = 2, 8, 32
    hidden_dim = [64]
    num_classes = 16

    key = jax.random.PRNGKey(0)
    key, xk = jax.random.split(key)
    x = jax.random.normal(xk, (batch, seq, model_dim), jnp.float32)

    weights, biases = init_class_head_params(
        key, model_dim, hidden_dim, num_classes, dtype=jnp.float32)

    # --- f32 params: single block, native (unpadded) feature dims -------------
    out = jax.block_until_ready(
        class_head_forward(x, weights, biases, activation=jnp.tanh))
    ref = _ref_forward(x, weights, biases, activation=jnp.tanh)
    assert out.shape == (batch, seq, num_classes)
    assert jnp.allclose(out, ref, atol=1e-4, rtol=1e-4)

    # --- ragged M (154 rows, tm=64): cdiv grid + masked boundary block --------
    key, xk2 = jax.random.split(key)
    x2 = jax.random.normal(xk2, (2, 77, model_dim), jnp.float32)
    out2 = jax.block_until_ready(
        class_head_forward(x2, weights, biases, activation=jnp.tanh, tm=64))
    ref2 = _ref_forward(x2, weights, biases, activation=jnp.tanh)
    assert out2.shape == (2, 77, num_classes)
    assert jnp.allclose(out2, ref2, atol=1e-4, rtol=1e-4)

    # --- bf16 params (v6e/v7x native MXU path): in-kernel x cast, f32 acc -----
    weights_bf = [w.astype(jnp.bfloat16) for w in weights]
    biases_bf = [b.astype(jnp.bfloat16) for b in biases]
    out_bf = jax.block_until_ready(
        class_head_forward(x, weights_bf, biases_bf, activation=jnp.tanh))
    assert out_bf.dtype == jnp.bfloat16
    assert jnp.allclose(out_bf.astype(jnp.float32), ref, atol=1e-1, rtol=1e-1)

    print("KERNEL_OK")
</pallas_src>

<mosaic_0001>
module attributes {stable_mosaic.version = 11 : i64} {
  func.func @kernel(%arg0: i32, %arg1: memref<16x32xf32, #tpu.memory_space<vmem>>, %arg2: memref<32x64xf32, #tpu.memory_space<vmem>>, %arg3: memref<64x16xf32, #tpu.memory_space<vmem>>, %arg4: memref<1x64xf32, #tpu.memory_space<vmem>>, %arg5: memref<1x16xf32, #tpu.memory_space<vmem>>, %arg6: memref<16x16xf32, #tpu.memory_space<vmem>>) attributes {dimension_semantics = [#tpu.dimension_semantics<parallel>], iteration_bounds = array<i64: 1>, scalar_prefetch = 0 : i64, scratch_operands = 0 : i64, tpu.core_type = #tpu.core_type<tc>, window_params = [{transform_indices = @transform_0, window_bounds = array<i64: 16, 32>}, {pipeline_mode = #tpu.pipeline_mode<synchronous>, transform_indices = @transform_1, window_bounds = array<i64: 32, 64>}, {pipeline_mode = #tpu.pipeline_mode<synchronous>, transform_indices = @transform_2, window_bounds = array<i64: 64, 16>}, {pipeline_mode = #tpu.pipeline_mode<synchronous>, transform_indices = @transform_3, window_bounds = array<i64: 1, 64>}, {pipeline_mode = #tpu.pipeline_mode<synchronous>, transform_indices = @transform_4, window_bounds = array<i64: 1, 16>}, {transform_indices = @transform_5, window_bounds = array<i64: 16, 16>}]} {
    %c0 = arith.constant 0 : index
    %c0_0 = arith.constant 0 : index
    %0 = vector.load %arg1[%c0, %c0_0] : memref<16x32xf32, #tpu.memory_space<vmem>>, vector<16x32xf32>
    %c0_1 = arith.constant 0 : index
    %c0_2 = arith.constant 0 : index
    %1 = vector.load %arg2[%c0_1, %c0_2] : memref<32x64xf32, #tpu.memory_space<vmem>>, vector<32x64xf32>
    %cst = arith.constant dense<0.000000e+00> : vector<16x64xf32>
    %2 = tpu.matmul %0, %1, %cst {dimension_numbers = #tpu.dot_dimension_numbers<[1], [0], [0], [1], [0, 0, 1, 1], [], []>} : vector<16x32xf32>, vector<32x64xf32>, vector<16x64xf32> -> vector<16x64xf32>
    %c0_3 = arith.constant 0 : index
    %c0_4 = arith.constant 0 : index
    %3 = vector.load %arg4[%c0_3, %c0_4] : memref<1x64xf32, #tpu.memory_space<vmem>>, vector<1x64xf32>
    %4 = vector.broadcast %3 : vector<1x64xf32> to vector<16x64xf32>
    %5 = arith.addf %2, %4 : vector<16x64xf32>
    %6 = math.tanh %5 : vector<16x64xf32>
    %c0_5 = arith.constant 0 : index
    %c0_6 = arith.constant 0 : index
    %7 = vector.load %arg3[%c0_5, %c0_6] : memref<64x16xf32, #tpu.memory_space<vmem>>, vector<64x16xf32>
    %cst_7 = arith.constant dense<0.000000e+00> : vector<16x16xf32>
    %8 = tpu.matmul %6, %7, %cst_7 {dimension_numbers = #tpu.dot_dimension_numbers<[1], [0], [0], [1], [0, 0, 1, 1], [], []>} : vector<16x64xf32>, vector<64x16xf32>, vector<16x16xf32> -> vector<16x16xf32>
    %c0_8 = arith.constant 0 : index
    %c0_9 = arith.constant 0 : index
    %9 = vector.load %arg5[%c0_8, %c0_9] : memref<1x16xf32, #tpu.memory_space<vmem>>, vector<1x16xf32>
    %10 = vector.broadcast %9 : vector<1x16xf32> to vector<16x16xf32>
    %11 = arith.addf %8, %10 : vector<16x16xf32>
    %c0_10 = arith.constant 0 : index
    %c0_11 = arith.constant 0 : index
    %12 = vector.load %arg6[%c0_10, %c0_11] : memref<16x16xf32, #tpu.memory_space<vmem>>, vector<16x16xf32>
    tpu.vector_store %arg6[%c0_10, %c0_11], %11 {strides = array<i32>} : memref<16x16xf32, #tpu.memory_space<vmem>>, vector<16x16xf32>,
    return
  }
  func.func @transform_0(%arg0: i32) -> (i32, i32) {
    %c0_i32 = arith.constant 0 : i32
    %c0_i32_0 = arith.constant 0 : i32
    return %arg0, %c0_i32 : i32, i32
  }
  func.func @transform_1(%arg0: i32) -> (i32, i32) {
    %c0_i32 = arith.constant 0 : i32
    %c0_i32_0 = arith.constant 0 : i32
    %c0_i32_1 = arith.constant 0 : i32
    return %c0_i32, %c0_i32_0 : i32, i32
  }
  func.func @transform_2(%arg0: i32) -> (i32, i32) {
    %c0_i32 = arith.constant 0 : i32
    %c0_i32_0 = arith.constant 0 : i32
    %c0_i32_1 = arith.constant 0 : i32
    return %c0_i32, %c0_i32_0 : i32, i32
  }
  func.func @transform_3(%arg0: i32) -> (i32, i32) {
    %c0_i32 = arith.constant 0 : i32
    %c0_i32_0 = arith.constant 0 : i32
    %c0_i32_1 = arith.constant 0 : i32
    return %c0_i32, %c0_i32_0 : i32, i32
  }
  func.func @transform_4(%arg0: i32) -> (i32, i32) {
    %c0_i32 = arith.constant 0 : i32
    %c0_i32_0 = arith.constant 0 : i32
    %c0_i32_1 = arith.constant 0 : i32
    return %c0_i32, %c0_i32_0 : i32, i32
  }
  func.func @transform_5(%arg0: i32) -> (i32, i32) {
    %c0_i32 = arith.constant 0 : i32
    %c0_i32_0 = arith.constant 0 : i32
    return %arg0, %c0_i32 : i32, i32
  }
}

module attributes {stable_mosaic.version = 11 : i64} {
  func.func @kernel(%arg0: i32, %arg1: memref<16x32xf32, #tpu.memory_space<vmem>>, %arg2: memref<32x64xf32, #tpu.memory_space<vmem>>, %arg3: memref<64x16xf32, #tpu.memory_space<vmem>>, %arg4: memref<1x64xf32, #tpu.memory_space<vmem>>, %arg5: memref<1x16xf32, #tpu.memory_space<vmem>>, %arg6: memref<16x16xf32, #tpu.memory_space<vmem>>) attributes {dimension_semantics = [#tpu.dimension_semantics<parallel>], iteration_bounds = array<i64: 1>, scalar_prefetch = 0 : i64, scratch_operands = 0 : i64, tpu.core_type = #tpu.core_type<tc>, window_params = [{transform_indices = @transform_0, window_bounds = array<i64: 16, 32>}, {pipeline_mode = #tpu.pipeline_mode<synchronous>, transform_indices = @transform_1, window_bounds = array<i64: 32, 64>}, {pipeline_mode = #tpu.pipeline_mode<synchronous>, transform_indices = @transform_2, window_bounds = array<i64: 64, 16>}, {pipeline_mode = #tpu.pipeline_mode<synchronous>, transform_indices = @transform_3, window_bounds = array<i64: 1, 64>}, {pipeline_mode = #tpu.pipeline_mode<synchronous>, transform_indices = @transform_4, window_bounds = array<i64: 1, 16>}, {transform_indices = @transform_5, window_bounds = array<i64: 16, 16>}]} {
    %c0 = arith.constant 0 : index
    %c0_0 = arith.constant 0 : index
    %0 = vector.load %arg1[%c0, %c0_0] : memref<16x32xf32, #tpu.memory_space<vmem>>, vector<16x32xf32>
    %c0_1 = arith.constant 0 : index
    %c0_2 = arith.constant 0 : index
    %1 = vector.load %arg2[%c0_1, %c0_2] : memref<32x64xf32, #tpu.memory_space<vmem>>, vector<32x64xf32>
    %cst = arith.constant dense<0.000000e+00> : vector<16x64xf32>
    %2 = tpu.matmul %0, %1, %cst {dimension_numbers = #tpu.dot_dimension_numbers<[1], [0], [0], [1], [0, 0, 1, 1], [], []>} : vector<16x32xf32>, vector<32x64xf32>, vector<16x64xf32> -> vector<16x64xf32>
    %c0_3 = arith.constant 0 : index
    %c0_4 = arith.constant 0 : index
    %3 = vector.load %arg4[%c0_3, %c0_4] : memref<1x64xf32, #tpu.memory_space<vmem>>, vector<1x64xf32>
    %4 = vector.broadcast %3 : vector<1x64xf32> to vector<16x64xf32>
    %5 = arith.addf %2, %4 : vector<16x64xf32>
    %6 = math.tanh %5 : vector<16x64xf32>
    %c0_5 = arith.constant 0 : index
    %c0_6 = arith.constant 0 : index
    %7 = vector.load %arg3[%c0_5, %c0_6] : memref<64x16xf32, #tpu.memory_space<vmem>>, vector<64x16xf32>
    %cst_7 = arith.constant dense<0.000000e+00> : vector<16x16xf32>
    %8 = tpu.matmul %6, %7, %cst_7 {dimension_numbers = #tpu.dot_dimension_numbers<[1], [0], [0], [1], [0, 0, 1, 1], [], []>} : vector<16x64xf32>, vector<64x16xf32>, vector<16x16xf32> -> vector<16x16xf32>
    %c0_8 = arith.constant 0 : index
    %c0_9 = arith.constant 0 : index
    %9 = vector.load %arg5[%c0_8, %c0_9] : memref<1x16xf32, #tpu.memory_space<vmem>>, vector<1x16xf32>
    %10 = vector.broadcast %9 : vector<1x16xf32> to vector<16x16xf32>
    %11 = arith.addf %8, %10 : vector<16x16xf32>
    %c0_10 = arith.constant 0 : index
    %c0_11 = arith.constant 0 : index
    %12 = vector.load %arg6[%c0_10, %c0_11] : memref<16x16xf32, #tpu.memory_space<vmem>>, vector<16x16xf32>
    tpu.vector_store %arg6[%c0_10, %c0_11], %11 {strides = array<i32>} : memref<16x16xf32, #tpu.memory_space<vmem>>, vector<16x16xf32>,
    return
  }
  func.func @transform_0(%arg0: i32) -> (i32, i32) {
    %c0_i32 = arith.constant 0 : i32
    %c0_i32_0 = arith.constant 0 : i32
    return %arg0, %c0_i32 : i32, i32
  }
  func.func @transform_1(%arg0: i32) -> (i32, i32) {
    %c0_i32 = arith.constant 0 : i32
    %c0_i32_0 = arith.constant 0 : i32
    %c0_i32_1 = arith.constant 0 : i32
    return %c0_i32, %c0_i32_0 : i32, i32
  }
  func.func @transform_2(%arg0: i32) -> (i32, i32) {
    %c0_i32 = arith.constant 0 : i32
    %c0_i32_0 = arith.constant 0 : i32
    %c0_i32_1 = arith.constant 0 : i32
    return %c0_i32, %c0_i32_0 : i32, i32
  }
  func.func @transform_3(%arg0: i32) -> (i32, i32) {
    %c0_i32 = arith.constant 0 : i32
    %c0_i32_0 = arith.constant 0 : i32
    %c0_i32_1 = arith.constant 0 : i32
    return %c0_i32, %c0_i32_0 : i32, i32
  }
  func.func @transform_4(%arg0: i32) -> (i32, i32) {
    %c0_i32 = arith.constant 0 : i32
    %c0_i32_0 = arith.constant 0 : i32
    %c0_i32_1 = arith.constant 0 : i32
    return %c0_i32, %c0_i32_0 : i32, i32
  }
  func.func @transform_5(%arg0: i32) -> (i32, i32) {
    %c0_i32 = arith.constant 0 : i32
    %c0_i32_0 = arith.constant 0 : i32
    return %arg0, %c0_i32 : i32, i32
  }
}

</mosaic_0001>

<bundles_post_ra>
// kernel: tpu_custom_call.1
= control target key start
LH: loop header
LB: loop body
LE: loop exit
PB: predicated region body
PF: predicated region fallthrough
CT: control target
= control target key end

     0   :  { %vm34_vm0 = vcmask 261120   ;;  %s434_s0 = inlined_call_operand.vmem [shape: f32[16,32], index: 0, kind: input, shape index: {}]   ;;  %s435_s1 = inlined_call_operand.vmem [shape: f32[32,64], index: 1, kind: input, shape index: {}]   ;;  %s436_s2 = inlined_call_operand.vmem [shape: f32[64,16], index: 2, kind: input, shape index: {}]   ;;  %s437_s3 = inlined_call_operand.vmem [shape: f32[1,64], index: 3, kind: input, shape index: {}]   ;;  %s438_s4 = inlined_call_operand.vmem [shape: f32[1,16], index: 4, kind: input, shape index: {}]   ;;  %s439_s5 = inlined_call_operand.hbm [shape: f32[16,16], index: 5, kind: output, shape index: {}]  }
   0x1   :  { %v23_v0 = vld [vmem:[%s435_s1] sm:$0xff]  ;;  %v24_v1 = vld [vmem:[%s435_s1 + $0x8] sm:$0xff]  ;;  %v25_v2 = vld [vmem:[%s435_s1 + $0x10] sm:$0xff] }
   0x2   :  { %v286_v3 = vpack.c.bf16 %v24_v1, %v23_v0  ;;  %v26_v4 = vld [vmem:[%s435_s1 + $0x18] sm:$0xff]  ;;  %v21_v5 = vld [vmem:[%s434_s0] sm:$0xff] }
   0x3   :  { %v290_v6 = vpack.c.bf16 %v26_v4, %v25_v2  ;;  %264 = vmatprep.mubr.msk.f32.mxu0 %vm34_vm0, %v21_v5 }
   0x4   :  { %10 = vsyncpa [#allocation3], 0  ;;  %287 = vmatprep.subr.bf16.mxu0 %v286_v3  ;;  %v22_v7 = vld [vmem:[%s434_s0 + $0x8] sm:$0xff]  ;;  %v118_v8 = vld [vmem:[%s436_s2] sm:$0xff]  ;;  %vm133_vm1 = vcmask 523264   ;;  %s341_s22 = smov [#allocation2]  }
   0x5   :  { %289 = vmatpush3.bf16.msra.mxu0 %v286_v3  ;;  %v119_v9 = vld [vmem:[%s436_s2 + $0x8] sm:$0xff]  ;;  %v120_v11 = vld [vmem:[%s436_s2 + $0x10] sm:$0xff]  ;;  %v121_v12 = vld [vmem:[%s436_s2 + $0x18] sm:$0xff]  ;;  %s223_s23 = sshll.u32 %s341_s22, 4  ;;  %vm215_vm2 = vcmask 130048   ;;  %s224_s23 = int_to_ptr.vmem [resolvable:$true] %s223_s23 }
   0x6   :  { %291 = vmatprep.subr.bf16.mxu0 %v290_v6  ;;  %v294_v10 = vpack.c.bf16 %v119_v9, %v118_v8  ;;  %v298_v13 = vpack.c.bf16 %v121_v12, %v120_v11  ;;  %v122_v14 = vld [vmem:[%s436_s2 + $0x20] sm:$0xff]  ;;  %v123_v15 = vld [vmem:[%s436_s2 + $0x28] sm:$0xff]  ;;  %v124_v16 = vld [vmem:[%s436_s2 + $0x30] sm:$0xff]  ;;  %p322_p1 = scmp.lt.s32.totalorder %s224_s23, %s224_s23 }
   0x7   :  { %v302_v17 = vpack.c.bf16 %v123_v15, %v122_v14  ;;  %v125_v18 = vld [vmem:[%s436_s2 + $0x38] sm:$0xff]  ;;  %v234_v20 = vld [vmem:[%s437_s3] ss:$0 sm:$0xff]  ;;  %s317_s3 = scalar_lea.vmem %s224_s23, 256 }
   0x8   :  { %295 = vmatprep.subr.bf16.mxu1 %v294_v10  ;;  %v306_v19 = vpack.c.bf16 %v125_v18, %v124_v16  ;;  %v237_v27 = vld [vmem:[%s438_s4] ss:$0 sm:$0xff]  ;;  %p318_p0 = scmp.ne.s32.totalorder %s224_s23, %s317_s3  ;;  %p323_p2 = scmp.lt.s32.totalorder %s317_s3, %s317_s3 }
   0x9   :  { %293 = vmatpush3.bf16.msra.mxu0 %v290_v6  ;;  %297 = vmatpush3.bf16.msra.mxu1 %v294_v10 }
   0xa   :  { %299 = vmatprep.subr.bf16.mxu1 %v298_v13  ;;  %p324_p3 = por %p323_p2, %p322_p1 }
   0xc   :  { %265 = vmatmul.mubr.msk.f32.vlgmr.msra.gmra.mrb[0].mxu0 %vm34_vm0, %v22_v7  ;;  %p325_p4 = pnand %p324_p3, %p318_p0 }
   0xd   :  { %301 = vmatpush3.bf16.msra.mxu1 %v298_v13 }
   0xe   :  { %303 = vmatprep.subr.bf16.mxu1 %v302_v17 }
  0x11   :  { %305 = vmatpush3.bf16.msra.mxu1 %v302_v17 }
  0x12   :  { %307 = vmatprep.subr.bf16.mxu1 %v306_v19 }
  0x15   :  { %309 = vmatpush3.bf16.msra.mxu1 %v306_v19 }
  0xdf   :  { %v266_v21 = vpop.f32.mrb[0].mxu0 }
  0xe0   :  { %v113_v22 = vadd.f32 %v266_v21, %v234_v20  ;;  %v107_v23 = vpop.f32.mrb[1].mxu0 }
  0xe1   :  { %v108_v24 = vadd.f32 %v234_v20, %v107_v23 }
  0xe3   :  { %313 = vtanh.f32 %v108_v24 }
  0xe4   :  { %315 = vtanh.f32 %v113_v22 }
  0xed   :  { %v314_v25 = vpop.eup %313 }
  0xee   :  { %v316_v26 = vpop.eup %315  ;;  %283 = vmatprep.mubr.msk.f32.mxu1 %vm133_vm1, %v314_v25 }
  0xef   :  { %284 = vmatmul.mubr.msk.f32.vlgmr.msra.gmra.mrb[0].mxu1 %vm133_vm1, %v316_v26 }
 0x1c2   :  { %v285_v28 = vpop.f32.mrb[0].mxu1 }
 0x1c3   :  { %v212_v29 = vadd.f32 %v285_v28, %v237_v27  ;;  %v206_v30 = vpop.f32.mrb[1].mxu1 }
 0x1c4   :  { %v207_v31 = vadd.f32 %v237_v27, %v206_v30 }
 0x1c5   :  { %217 = vst.msk [vmem:[#allocation2 + $0x8] sm:$0xff] %vm215_vm2, %v212_v29 }
 0x1c6   :  { %216 = vst.msk [vmem:[#allocation2] sm:$0xff] %vm215_vm2, %v207_v31 }
 0x1c7   :  { %328 = shalt.err (!%p325_p4)
}
 0x1c8   :  { %s329_s4 = scalar_lea.hbm %s439_s5, 256 }
 0x1c9   :  { %p330_p5 = scmp.ne.s32.totalorder %s439_s5, %s329_s4  ;;  %p333_p6 = scmp.lt.u32.totalorder %s329_s4, %s439_s5 }
 0x1cb   :  { %p335_p7 = pnand %p333_p6, %p330_p5 }
 0x1cd   :  { %338 = shalt.err (!%p335_p7)
}
 0x1ce   :  { %s342_s30 = smov 128   ;;  %s343_s6 = smov 8  }
 0x1cf   :  { %229 = dma.vmem_to_hbm [thread:$0]  %s224_s23, 256, %s439_s5, [#allocation3], %s342_s30, %s342_s30, %s343_s6  }
 0x1d0   :  { %339 = dma.done.wait [#allocation3], 256  }
 0x1d1   :  { %340 = vsyncadd [#allocation3], 4294967040 }
 0x1d2   :  { %233 = vsyncpa [#allocation3], 1 }

// kernel: tpu_custom_call.1
= control target key start
LH: loop header
LB: loop body
LE: loop exit
PB: predicated region body
PF: predicated region fallthrough
CT: control target
= control target key end

     0   :  { %vm34_vm0 = vcmask 261120   ;;  %s434_s0 = inlined_call_operand.vmem [shape: f32[16,32], index: 0, kind: input, shape index: {}]   ;;  %s435_s1 = inlined_call_operand.vmem [shape: f32[32,64], index: 1, kind: input, shape index: {}]   ;;  %s436_s2 = inlined_call_operand.vmem [shape: f32[64,16], index: 2, kind: input, shape index: {}]   ;;  %s437_s3 = inlined_call_operand.vmem [shape: f32[1,64], index: 3, kind: input, shape index: {}]   ;;  %s438_s4 = inlined_call_operand.vmem [shape: f32[1,16], index: 4, kind: input, shape index: {}]   ;;  %s439_s5 = inlined_call_operand.hbm [shape: f32[16,16], index: 5, kind: output, shape index: {}]  }
   0x1   :  { %v23_v0 = vld [vmem:[%s435_s1] sm:$0xff]  ;;  %v24_v1 = vld [vmem:[%s435_s1 + $0x8] sm:$0xff]  ;;  %v25_v2 = vld [vmem:[%s435_s1 + $0x10] sm:$0xff] }
   0x2   :  { %v286_v3 = vpack.c.bf16 %v24_v1, %v23_v0  ;;  %v26_v4 = vld [vmem:[%s435_s1 + $0x18] sm:$0xff]  ;;  %v21_v5 = vld [vmem:[%s434_s0] sm:$0xff] }
   0x3   :  { %v290_v6 = vpack.c.bf16 %v26_v4, %v25_v2  ;;  %264 = vmatprep.mubr.msk.f32.mxu0 %vm34_vm0, %v21_v5 }
   0x4   :  { %10 = vsyncpa [#allocation3], 0  ;;  %287 = vmatprep.subr.bf16.mxu0 %v286_v3  ;;  %v22_v7 = vld [vmem:[%s434_s0 + $0x8] sm:$0xff]  ;;  %v118_v8 = vld [vmem:[%s436_s2] sm:$0xff]  ;;  %vm133_vm1 = vcmask 523264   ;;  %s341_s22 = smov [#allocation2]  }
   0x5   :  { %289 = vmatpush3.bf16.msra.mxu0 %v286_v3  ;;  %v119_v9 = vld [vmem:[%s436_s2 + $0x8] sm:$0xff]  ;;  %v120_v11 = vld [vmem:[%s436_s2 + $0x10] sm:$0xff]  ;;  %v121_v12 = vld [vmem:[%s436_s2 + $0x18] sm:$0xff]  ;;  %s223_s23 = sshll.u32 %s341_s22, 4  ;;  %vm215_vm2 = vcmask 130048   ;;  %s224_s23 = int_to_ptr.vmem [resolvable:$true] %s223_s23 }
   0x6   :  { %291 = vmatprep.subr.bf16.mxu0 %v290_v6  ;;  %v294_v10 = vpack.c.bf16 %v119_v9, %v118_v8  ;;  %v298_v13 = vpack.c.bf16 %v121_v12, %v120_v11  ;;  %v122_v14 = vld [vmem:[%s436_s2 + $0x20] sm:$0xff]  ;;  %v123_v15 = vld [vmem:[%s436_s2 + $0x28] sm:$0xff]  ;;  %v124_v16 = vld [vmem:[%s436_s2 + $0x30] sm:$0xff]  ;;  %p322_p1 = scmp.lt.s32.totalorder %s224_s23, %s224_s23 }
   0x7   :  { %v302_v17 = vpack.c.bf16 %v123_v15, %v122_v14  ;;  %v125_v18 = vld [vmem:[%s436_s2 + $0x38] sm:$0xff]  ;;  %v234_v20 = vld [vmem:[%s437_s3] ss:$0 sm:$0xff]  ;;  %s317_s3 = scalar_lea.vmem %s224_s23, 256 }
   0x8   :  { %295 = vmatprep.subr.bf16.mxu1 %v294_v10  ;;  %v306_v19 = vpack.c.bf16 %v125_v18, %v124_v16  ;;  %v237_v27 = vld [vmem:[%s438_s4] ss:$0 sm:$0xff]  ;;  %p318_p0 = scmp.ne.s32.totalorder %s224_s23, %s317_s3  ;;  %p323_p2 = scmp.lt.s32.totalorder %s317_s3, %s317_s3 }
   0x9   :  { %293 = vmatpush3.bf16.msra.mxu0 %v290_v6  ;;  %297 = vmatpush3.bf16.msra.mxu1 %v294_v10 }
   0xa   :  { %299 = vmatprep.subr.bf16.mxu1 %v298_v13  ;;  %p324_p3 = por %p323_p2, %p322_p1 }
   0xc   :  { %265 = vmatmul.mubr.msk.f32.vlgmr.msra.gmra.mrb[0].mxu0 %vm34_vm0, %v22_v7  ;;  %p325_p4 = pnand %p324_p3, %p318_p0 }
   0xd   :  { %301 = vmatpush3.bf16.msra.mxu1 %v298_v13 }
   0xe   :  { %303 = vmatprep.subr.bf16.mxu1 %v302_v17 }
  0x11   :  { %305 = vmatpush3.bf16.msra.mxu1 %v302_v17 }
  0x12   :  { %307 = vmatprep.subr.bf16.mxu1 %v306_v19 }
  0x15   :  { %309 = vmatpush3.bf16.msra.mxu1 %v306_v19 }
  0xdf   :  { %v266_v21 = vpop.f32.mrb[0].mxu0 }
  0xe0   :  { %v113_v22 = vadd.f32 %v266_v21, %v234_v20  ;;  %v107_v23 = vpop.f32.mrb[1].mxu0 }
  0xe1   :  { %v108_v24 = vadd.f32 %v234_v20, %v107_v23 }
  0xe3   :  { %313 = vtanh.f32 %v108_v24 }
  0xe4   :  { %315 = vtanh.f32 %v113_v22 }
  0xed   :  { %v314_v25 = vpop.eup %313 }
  0xee   :  { %v316_v26 = vpop.eup %315  ;;  %283 = vmatprep.mubr.msk.f32.mxu1 %vm133_vm1, %v314_v25 }
  0xef   :  { %284 = vmatmul.mubr.msk.f32.vlgmr.msra.gmra.mrb[0].mxu1 %vm133_vm1, %v316_v26 }
 0x1c2   :  { %v285_v28 = vpop.f32.mrb[0].mxu1 }
 0x1c3   :  { %v212_v29 = vadd.f32 %v285_v28, %v237_v27  ;;  %v206_v30 = vpop.f32.mrb[1].mxu1 }
 0x1c4   :  { %v207_v31 = vadd.f32 %v237_v27, %v206_v30 }
 0x1c5   :  { %217 = vst.msk [vmem:[#allocation2 + $0x8] sm:$0xff] %vm215_vm2, %v212_v29 }
 0x1c6   :  { %216 = vst.msk [vmem:[#allocation2] sm:$0xff] %vm215_vm2, %v207_v31 }
 0x1c7   :  { %328 = shalt.err (!%p325_p4)
}
 0x1c8   :  { %s329_s4 = scalar_lea.hbm %s439_s5, 256 }
 0x1c9   :  { %p330_p5 = scmp.ne.s32.totalorder %s439_s5, %s329_s4  ;;  %p333_p6 = scmp.lt.u32.totalorder %s329_s4, %s439_s5 }
 0x1cb   :  { %p335_p7 = pnand %p333_p6, %p330_p5 }
 0x1cd   :  { %338 = shalt.err (!%p335_p7)
}
 0x1ce   :  { %s342_s30 = smov 128   ;;  %s343_s6 = smov 8  }
 0x1cf   :  { %229 = dma.vmem_to_hbm [thread:$0]  %s224_s23, 256, %s439_s5, [#allocation3], %s342_s30, %s342_s30, %s343_s6  }
 0x1d0   :  { %339 = dma.done.wait [#allocation3], 256  }
 0x1d1   :  { %340 = vsyncadd [#allocation3], 4294967040 }
 0x1d2   :  { %233 = vsyncpa [#allocation3], 1 }

</bundles_post_ra>
